<compile_context>
chip_gen: v7x
topology: tpu7x:2x2x1
jax: 0.10.0
libtpu: 0.0.40
codegen_flags: <defaults>
</compile_context>

<pallas_src>
import functools
import math

import jax
import jax.numpy as jnp
from jax import lax
from jax.experimental import pallas as pl
from jax.experimental.pallas import tpu as pltpu


def _conv_kernel(xp_ref, w_ref, b_ref, o_ref, patch_ref, *,
                 k, wp, c_in_p, csub, n_sub, lanes_blk, n_r, sub_align):
    """One (c_out tile, batch image, row-chunk) grid step.

    xp_ref   : (1, C_in_p, L_in)   bf16  full padded image (resident per batch)
    w_ref    : (TCO, K*K*C_in_p)   bf16  folded weights   (resident per co tile)
    b_ref    : (TCO, 1)            f32   scaled bias
    o_ref    : (1, TCO, rt*wp)     f32   this chunk's output rows (flattened)
    patch_ref: (K*K*C_in_p, csub)  bf16  scratch patch matrix
    """
    if n_r == 1:
        base = 0                                   # fully static path
    else:
        # wrapper guarantees rt*wp % 128 == 0 whenever n_r > 1
        base = pl.multiple_of(pl.program_id(2) * lanes_blk, 128)

    wmat = w_ref[...]
    bvec = b_ref[...]

    def compute_chunk(off_in, off_out):
        # Build the (K*K*C_in_p, csub) patch: one aligned scratch store per tap
        # (no concatenate; c_in_p is a multiple of 16 so sublane offsets are
        # native-tile aligned for bf16).
        for kh in range(k):
            for kw in range(k):
                t = kh * k + kw
                patch_ref[t * c_in_p:(t + 1) * c_in_p, :] = (
                    xp_ref[0, :, pl.ds(off_in + kh * wp + kw, csub)])
        acc = jnp.dot(wmat, patch_ref[...], preferred_element_type=jnp.float32)
        o_ref[0, :, pl.ds(off_out, csub)] = acc + bvec

    if n_sub == 1:
        compute_chunk(base, 0)
    elif n_sub <= 8:
        for s in range(n_sub):                     # short static unroll
            compute_chunk(base + s * csub, s * csub)
    else:
        def body(s, carry):                        # bounded live ranges
            off = pl.multiple_of(s * csub, sub_align)
            compute_chunk(base + off, off)
            return carry
        lax.fori_loop(0, n_sub, body, 0)


def _divisors(x):
    out = set()
    d = 1
    while d * d <= x:
        if x % d == 0:
            out.add(d)
            out.add(x // d)
        d += 1
    return sorted(out)


def _tpu_vmem_and_mxu():
    vmem_cap = None
    try:
        vmem_cap = pltpu.get_tpu_info().vmem_capacity_bytes
    except Exception:
        vmem_cap = None
    kind = ""
    try:
        kind = jax.devices()[0].device_kind.lower()
    except Exception:
        pass
    is_v5e = ("v5 lite" in kind) or ("v5e" in kind) or ("v5litepod" in kind)
    is_v7 = "v7" in kind
    if not vmem_cap:
        vmem_cap = (64 << 20) if is_v7 else (128 << 20)
    mxu_n = 128 if is_v5e else 256
    return int(vmem_cap), mxu_n


def _pick_tco(c_out, mxu_n):
    cap = max(mxu_n, 128)
    if c_out <= cap:
        return c_out
    for t in range(cap, 0, -1):        # MXU-friendly (multiple of 128) divisor
        if c_out % t == 0 and t % 128 == 0:
            return t
    for t in range(cap, 0, -1):        # sublane-friendly fallback
        if c_out % t == 0 and t % 8 == 0:
            return t
    return c_out


def _pick_rt(h, wp, tco, out_budget):
    divs = _divisors(h)
    aligned = [d for d in divs if (d * wp) % 128 == 0]
    cands = aligned if aligned else [h]     # rt == h -> block == full last dim
    fitting = [d for d in cands if tco * d * wp * 4 <= out_budget]
    return max(fitting) if fitting else min(cands)


def _pick_csub(lanes, kk, c_in_p, patch_budget):
    max_csub = max(128, patch_budget // (kk * c_in_p * 2))
    divs = _divisors(lanes)
    aligned = [d for d in divs if d % 128 == 0 and d <= max_csub]
    if aligned:
        return max(aligned)
    if kk * c_in_p * lanes * 2 <= patch_budget:
        return lanes
    return max(d for d in divs if d <= max_csub)


def myconv2d_forward(x, weight, bias=None, w_mul=1.0, b_mul=1.0):
    """Pallas-TPU equivalent of F.conv2d(x, weight*w_mul, bias*b_mul, padding=K//2)."""
    n, c_in, h, w = x.shape
    c_out, c_in_w, k, k2 = weight.shape
    assert c_in_w == c_in and k == k2
    assert k % 2 == 1, "MyConv2d default path assumes odd K (padding = K // 2)"
    pad = k // 2
    kk = k * k
    hp, wp = h + 2 * pad, w + 2 * pad

    vmem_cap, mxu_n = _tpu_vmem_and_mxu()

    # Pad channels to a bf16-sublane-friendly multiple of 16; zero channels x
    # zero weights contribute nothing.
    c_in_p = ((c_in + 15) // 16) * 16

    # ---- single fused input glue pass (cast + pad + flatten) ----
    # Bottom is padded by pad+1 rows so every (kh, kw) tap window of the last
    # row-chunk stays in bounds without a second tail pad.
    xp = jnp.pad(x.astype(jnp.bfloat16),
                 ((0, 0), (0, c_in_p - c_in), (pad, pad + 1), (pad, pad)))
    l_in = (hp + 1) * wp
    xp = xp.reshape(n, c_in_p, l_in)

    # Fold K*K taps into the contraction dim (tap-major): (C_out, KK*C_in_p).
    w_folded = jnp.transpose(weight.astype(jnp.float32) * w_mul, (0, 2, 3, 1))
    w_folded = jnp.pad(w_folded, ((0, 0), (0, 0), (0, 0), (0, c_in_p - c_in)))
    w_folded = w_folded.reshape(c_out, kk * c_in_p).astype(jnp.bfloat16)

    if bias is None:
        b_scaled = jnp.zeros((c_out, 1), jnp.float32)
    else:
        b_scaled = (bias.astype(jnp.float32) * b_mul).reshape(c_out, 1)

    # ---- generation-aware tiling ----
    out_budget = min(4 << 20, vmem_cap // 16)     # per-buffer f32 output block
    patch_budget = min(3 << 20, vmem_cap // 20)   # bf16 patch scratch

    tco = _pick_tco(c_out, mxu_n)
    while True:
        rt = _pick_rt(h, wp, tco, out_budget)
        csub = _pick_csub(rt * wp, kk, c_in_p, patch_budget)
        block_bytes = (2 * c_in_p * l_in * 2          # xp, double-buffered bf16
                       + 2 * tco * kk * c_in_p * 2    # folded weights
                       + 2 * tco * 4                  # bias
                       + 2 * tco * rt * wp * 4        # output block, f32
                       + kk * c_in_p * csub * 2       # patch scratch
                       + 2 * tco * csub * 4)          # matmul / bias transients
        # Prefer shrinking the c_out tile over raising the VMEM limit.
        if block_bytes <= int(0.55 * vmem_cap) or tco <= 8 or tco % 2:
            break
        if c_out % (tco // 2):
            break
        tco //= 2

    n_co = c_out // tco
    n_r = h // rt
    lanes_blk = rt * wp
    n_sub = lanes_blk // csub
    sub_align = math.gcd(csub, 128)

    kernel = functools.partial(
        _conv_kernel, k=k, wp=wp, c_in_p=c_in_p, csub=csub, n_sub=n_sub,
        lanes_blk=lanes_blk, n_r=n_r, sub_align=sub_align)

    cp_kwargs = dict(dimension_semantics=("parallel", "parallel", "parallel"))
    # Only raise the scoped-VMEM limit when the blocks genuinely need it, and
    # never above ~65% of this generation's physical VMEM (64 MiB on v7x).
    if block_bytes + (4 << 20) > (16 << 20):
        cp_kwargs["vmem_limit_bytes"] = int(
            min(max(block_bytes + (8 << 20), 32 << 20), 0.65 * vmem_cap))

    # TODO(synk): for very small images (h*wp << 512 lanes) several batch
    # images could be blocked per grid step to feed the MXU N-dim better.
    out = pl.pallas_call(
        kernel,
        out_shape=jax.ShapeDtypeStruct((n, c_out, h * wp), jnp.float32),
        grid=(n_co, n, n_r),          # batch / spatial innermost: weights stay
        in_specs=[                    # resident; xp resident across row-chunks
            pl.BlockSpec((1, c_in_p, l_in), lambda co, b, r: (b, 0, 0)),
            pl.BlockSpec((tco, kk * c_in_p), lambda co, b, r: (co, 0)),
            pl.BlockSpec((tco, 1), lambda co, b, r: (co, 0)),
        ],
        out_specs=pl.BlockSpec((1, tco, lanes_blk), lambda co, b, r: (b, co, r)),
        scratch_shapes=[pltpu.VMEM((kk * c_in_p, csub), jnp.bfloat16)],
        compiler_params=pltpu.CompilerParams(**cp_kwargs),
    )(xp, w_folded, b_scaled)

    # Drop the padded-width garbage columns and restore NCHW.
    # TODO(synk): a fused consumer could keep the padded (h, wp) layout (or a
    # bf16 output) and skip this extra HBM copy.
    return out.reshape(n, c_out, h, wp)[:, :, :, :w]


if __name__ == "__main__":
    # MyConv2d defaults: gain=sqrt(2), use_wscale=False, lrmul=1
    #   => init_std = he_std, w_mul = 1, b_mul = 1.
    N, C_IN, C_OUT, H, W, K = 2, 4, 8, 16, 16, 3
    gain = 2.0 ** 0.5
    lrmul = 1.0
    he_std = gain * (C_IN * K * K) ** (-0.5)
    init_std = he_std / lrmul
    w_mul = lrmul
    b_mul = lrmul

    key = jax.random.PRNGKey(0)
    kx, kw_key, kb = jax.random.split(key, 3)
    x = jax.random.normal(kx, (N, C_IN, H, W), dtype=jnp.float32)
    weight = jax.random.normal(kw_key, (C_OUT, C_IN, K, K), dtype=jnp.float32) * init_std
    bias = 0.1 * jax.random.normal(kb, (C_OUT,), dtype=jnp.float32)

    out = myconv2d_forward(x, weight, bias, w_mul, b_mul)
    out = jax.block_until_ready(out)
    assert out.shape == (N, C_OUT, H, W)

    pad_cfg = ((K // 2, K // 2), (K // 2, K // 2))
    # Reference with matching operand precision (bf16 operands, f32 accumulation).
    ref_bf16 = lax.conv_general_dilated(
        x.astype(jnp.bfloat16), (weight * w_mul).astype(jnp.bfloat16),
        window_strides=(1, 1), padding=pad_cfg,
        dimension_numbers=("NCHW", "OIHW", "NCHW"),
        preferred_element_type=jnp.float32,
    ) + (bias * b_mul).reshape(1, -1, 1, 1)
    assert jnp.allclose(out, ref_bf16, atol=2e-3, rtol=2e-3), "mismatch vs bf16 reference"

    # Loose sanity check vs the full-f32 reference conv (bf16 operand tolerance).
    ref_f32 = lax.conv_general_dilated(
        x, weight * w_mul, window_strides=(1, 1), padding=pad_cfg,
        dimension_numbers=("NCHW", "OIHW", "NCHW"),
    ) + (bias * b_mul).reshape(1, -1, 1, 1)
    assert jnp.allclose(out, ref_f32, atol=5e-2, rtol=5e-2), "mismatch vs f32 reference"

    print("KERNEL_OK")
</pallas_src>

<mosaic_0001>
module attributes {stable_mosaic.version = 11 : i64} {
  func.func @_conv_kernel(%arg0: i32, %arg1: i32, %arg2: i32, %arg3: memref<1x16x342xbf16, #tpu.memory_space<vmem>>, %arg4: memref<8x144xbf16, #tpu.memory_space<vmem>>, %arg5: memref<8x1xf32, #tpu.memory_space<vmem>>, %arg6: memref<1x8x288xf32, #tpu.memory_space<vmem>>, %arg7: memref<144x288xbf16, #tpu.memory_space<vmem>>) attributes {dimension_semantics = [#tpu.dimension_semantics<parallel>, #tpu.dimension_semantics<parallel>, #tpu.dimension_semantics<parallel>], iteration_bounds = array<i64: 1, 2, 1>, scalar_prefetch = 0 : i64, scratch_operands = 1 : i64, tpu.core_type = #tpu.core_type<tc>, window_params = [{transform_indices = @transform_0, window_bounds = array<i64: 1, 16, 342>}, {transform_indices = @transform_1, window_bounds = array<i64: 8, 144>}, {transform_indices = @transform_2, window_bounds = array<i64: 8, 1>}, {transform_indices = @transform_3, window_bounds = array<i64: 1, 8, 288>}]} {
    %c0 = arith.constant 0 : index
    %c0_0 = arith.constant 0 : index
    %0 = vector.load %arg4[%c0, %c0_0] : memref<8x144xbf16, #tpu.memory_space<vmem>>, vector<8x144xbf16>
    %c0_1 = arith.constant 0 : index
    %c0_2 = arith.constant 0 : index
    %1 = vector.load %arg5[%c0_1, %c0_2] : memref<8x1xf32, #tpu.memory_space<vmem>>, vector<8x1xf32>
    %c0_3 = arith.constant 0 : index
    %c0_4 = arith.constant 0 : index
    %c0_5 = arith.constant 0 : index
    %2 = vector.load %arg3[%c0_3, %c0_4, %c0_5] : memref<1x16x342xbf16, #tpu.memory_space<vmem>>, vector<1x16x288xbf16>
    %3 = vector.shape_cast %2 : vector<1x16x288xbf16> to vector<16x288xbf16>
    %c0_6 = arith.constant 0 : index
    %c0_7 = arith.constant 0 : index
    %4 = vector.load %arg7[%c0_6, %c0_7] : memref<144x288xbf16, #tpu.memory_space<vmem>>, vector<16x288xbf16>
    tpu.vector_store %arg7[%c0_6, %c0_7], %3 {strides = array<i32>} : memref<144x288xbf16, #tpu.memory_space<vmem>>, vector<16x288xbf16>,
    %c0_8 = arith.constant 0 : index
    %c0_9 = arith.constant 0 : index
    %c1 = arith.constant 1 : index
    %5 = vector.load %arg3[%c0_8, %c0_9, %c1] : memref<1x16x342xbf16, #tpu.memory_space<vmem>>, vector<1x16x288xbf16>
    %6 = vector.shape_cast %5 : vector<1x16x288xbf16> to vector<16x288xbf16>
    %c16 = arith.constant 16 : index
    %c0_10 = arith.constant 0 : index
    %7 = vector.load %arg7[%c16, %c0_10] : memref<144x288xbf16, #tpu.memory_space<vmem>>, vector<16x288xbf16>
    tpu.vector_store %arg7[%c16, %c0_10], %6 {strides = array<i32>} : memref<144x288xbf16, #tpu.memory_space<vmem>>, vector<16x288xbf16>,
    %c0_11 = arith.constant 0 : index
    %c0_12 = arith.constant 0 : index
    %c2 = arith.constant 2 : index
    %8 = vector.load %arg3[%c0_11, %c0_12, %c2] : memref<1x16x342xbf16, #tpu.memory_space<vmem>>, vector<1x16x288xbf16>
    %9 = vector.shape_cast %8 : vector<1x16x288xbf16> to vector<16x288xbf16>
    %c32 = arith.constant 32 : index
    %c0_13 = arith.constant 0 : index
    %10 = vector.load %arg7[%c32, %c0_13] : memref<144x288xbf16, #tpu.memory_space<vmem>>, vector<16x288xbf16>
    tpu.vector_store %arg7[%c32, %c0_13], %9 {strides = array<i32>} : memref<144x288xbf16, #tpu.memory_space<vmem>>, vector<16x288xbf16>,
    %c0_14 = arith.constant 0 : index
    %c0_15 = arith.constant 0 : index
    %c18 = arith.constant 18 : index
    %11 = vector.load %arg3[%c0_14, %c0_15, %c18] : memref<1x16x342xbf16, #tpu.memory_space<vmem>>, vector<1x16x288xbf16>
    %12 = vector.shape_cast %11 : vector<1x16x288xbf16> to vector<16x288xbf16>
    %c48 = arith.constant 48 : index
    %c0_16 = arith.constant 0 : index
    %13 = vector.load %arg7[%c48, %c0_16] : memref<144x288xbf16, #tpu.memory_space<vmem>>, vector<16x288xbf16>
    tpu.vector_store %arg7[%c48, %c0_16], %12 {strides = array<i32>} : memref<144x288xbf16, #tpu.memory_space<vmem>>, vector<16x288xbf16>,
    %c0_17 = arith.constant 0 : index
    %c0_18 = arith.constant 0 : index
    %c19 = arith.constant 19 : index
    %14 = vector.load %arg3[%c0_17, %c0_18, %c19] : memref<1x16x342xbf16, #tpu.memory_space<vmem>>, vector<1x16x288xbf16>
    %15 = vector.shape_cast %14 : vector<1x16x288xbf16> to vector<16x288xbf16>
    %c64 = arith.constant 64 : index
    %c0_19 = arith.constant 0 : index
    %16 = vector.load %arg7[%c64, %c0_19] : memref<144x288xbf16, #tpu.memory_space<vmem>>, vector<16x288xbf16>
    tpu.vector_store %arg7[%c64, %c0_19], %15 {strides = array<i32>} : memref<144x288xbf16, #tpu.memory_space<vmem>>, vector<16x288xbf16>,
    %c0_20 = arith.constant 0 : index
    %c0_21 = arith.constant 0 : index
    %c20 = arith.constant 20 : index
    %17 = vector.load %arg3[%c0_20, %c0_21, %c20] : memref<1x16x342xbf16, #tpu.memory_space<vmem>>, vector<1x16x288xbf16>
    %18 = vector.shape_cast %17 : vector<1x16x288xbf16> to vector<16x288xbf16>
    %c80 = arith.constant 80 : index
    %c0_22 = arith.constant 0 : index
    %19 = vector.load %arg7[%c80, %c0_22] : memref<144x288xbf16, #tpu.memory_space<vmem>>, vector<16x288xbf16>
    tpu.vector_store %arg7[%c80, %c0_22], %18 {strides = array<i32>} : memref<144x288xbf16, #tpu.memory_space<vmem>>, vector<16x288xbf16>,
    %c0_23 = arith.constant 0 : index
    %c0_24 = arith.constant 0 : index
    %c36 = arith.constant 36 : index
    %20 = vector.load %arg3[%c0_23, %c0_24, %c36] : memref<1x16x342xbf16, #tpu.memory_space<vmem>>, vector<1x16x288xbf16>
    %21 = vector.shape_cast %20 : vector<1x16x288xbf16> to vector<16x288xbf16>
    %c96 = arith.constant 96 : index
    %c0_25 = arith.constant 0 : index
    %22 = vector.load %arg7[%c96, %c0_25] : memref<144x288xbf16, #tpu.memory_space<vmem>>, vector<16x288xbf16>
    tpu.vector_store %arg7[%c96, %c0_25], %21 {strides = array<i32>} : memref<144x288xbf16, #tpu.memory_space<vmem>>, vector<16x288xbf16>,
    %c0_26 = arith.constant 0 : index
    %c0_27 = arith.constant 0 : index
    %c37 = arith.constant 37 : index
    %23 = vector.load %arg3[%c0_26, %c0_27, %c37] : memref<1x16x342xbf16, #tpu.memory_space<vmem>>, vector<1x16x288xbf16>
    %24 = vector.shape_cast %23 : vector<1x16x288xbf16> to vector<16x288xbf16>
    %c112 = arith.constant 112 : index
    %c0_28 = arith.constant 0 : index
    %25 = vector.load %arg7[%c112, %c0_28] : memref<144x288xbf16, #tpu.memory_space<vmem>>, vector<16x288xbf16>
    tpu.vector_store %arg7[%c112, %c0_28], %24 {strides = array<i32>} : memref<144x288xbf16, #tpu.memory_space<vmem>>, vector<16x288xbf16>,
    %c0_29 = arith.constant 0 : index
    %c0_30 = arith.constant 0 : index
    %c38 = arith.constant 38 : index
    %26 = vector.load %arg3[%c0_29, %c0_30, %c38] : memref<1x16x342xbf16, #tpu.memory_space<vmem>>, vector<1x16x288xbf16>
    %27 = vector.shape_cast %26 : vector<1x16x288xbf16> to vector<16x288xbf16>
    %c128 = arith.constant 128 : index
    %c0_31 = arith.constant 0 : index
    %28 = vector.load %arg7[%c128, %c0_31] : memref<144x288xbf16, #tpu.memory_space<vmem>>, vector<16x288xbf16>
    tpu.vector_store %arg7[%c128, %c0_31], %27 {strides = array<i32>} : memref<144x288xbf16, #tpu.memory_space<vmem>>, vector<16x288xbf16>,
    %c0_32 = arith.constant 0 : index
    %c0_33 = arith.constant 0 : index
    %29 = vector.load %arg7[%c0_32, %c0_33] : memref<144x288xbf16, #tpu.memory_space<vmem>>, vector<144x288xbf16>
    %cst = arith.constant dense<0.000000e+00> : vector<8x288xf32>
    %30 = tpu.matmul %0, %29, %cst {dimension_numbers = #tpu.dot_dimension_numbers<[1], [0], [0], [1], [0, 0, 1, 1], [], []>} : vector<8x144xbf16>, vector<144x288xbf16>, vector<8x288xf32> -> vector<8x288xf32>
    %31 = vector.broadcast %1 : vector<8x1xf32> to vector<8x288xf32>
    %32 = arith.addf %30, %31 : vector<8x288xf32>
    %c0_34 = arith.constant 0 : index
    %c0_35 = arith.constant 0 : index
    %c0_36 = arith.constant 0 : index
    %33 = vector.load %arg6[%c0_34, %c0_35, %c0_36] : memref<1x8x288xf32, #tpu.memory_space<vmem>>, vector<1x8x288xf32>
    %34 = vector.shape_cast %33 : vector<1x8x288xf32> to vector<8x288xf32>
    %35 = vector.shape_cast %32 : vector<8x288xf32> to vector<1x8x288xf32>
    tpu.vector_store %arg6[%c0_34, %c0_35, %c0_36], %35 {strides = array<i32>} : memref<1x8x288xf32, #tpu.memory_space<vmem>>, vector<1x8x288xf32>,
    return
  }
  func.func @transform_0(%arg0: i32, %arg1: i32, %arg2: i32) -> (i32, i32, i32) {
    %c0_i32 = arith.constant 0 : i32
    %c0_i32_0 = arith.constant 0 : i32
    %c0_i32_1 = arith.constant 0 : i32
    return %arg1, %c0_i32, %c0_i32_0 : i32, i32, i32
  }
  func.func @transform_1(%arg0: i32, %arg1: i32, %arg2: i32) -> (i32, i32) {
    %c0_i32 = arith.constant 0 : i32
    %c0_i32_0 = arith.constant 0 : i32
    return %arg0, %c0_i32 : i32, i32
  }
  func.func @transform_2(%arg0: i32, %arg1: i32, %arg2: i32) -> (i32, i32) {
    %c0_i32 = arith.constant 0 : i32
    %c0_i32_0 = arith.constant 0 : i32
    return %arg0, %c0_i32 : i32, i32
  }
  func.func @transform_3(%arg0: i32, %arg1: i32, %arg2: i32) -> (i32, i32, i32) {
    %c0_i32 = arith.constant 0 : i32
    return %arg1, %arg0, %arg2 : i32, i32, i32
  }
}

</mosaic_0001>

<bundles_post_ra>
// kernel: tpu_custom_call.1
= control target key start
LH: loop header
LB: loop body
LE: loop exit
PB: predicated region body
PF: predicated region fallthrough
CT: control target
= control target key end

     0   :  { %8 = vsyncpa [#allocation4], 0  ;;  %s1297_s0 = inlined_call_operand.hbm [shape: bf16[2,16,342], index: 0, kind: input, shape index: {}]   ;;  %s1298_s1 = inlined_call_operand.vmem [shape: bf16[8,144], index: 1, kind: input, shape index: {}]   ;;  %s1299_s2 = inlined_call_operand.vmem [shape: f32[8,1], index: 2, kind: input, shape index: {}]   ;;  %s1300_s3 = inlined_call_operand.hbm [shape: f32[2,8,288], index: 3, kind: output, shape index: {}]  }
   0x1   :  { %10 = vsyncpa [#allocation4 + $0x1], 0 }
   0x2   :  { %11 = vsyncpa [#allocation5], 0 }
   0x3   :  { %13 = vsyncpa [#allocation5 + $0x1], 0  ;;  %s1075_s12 = smov 0   ;;  %s1077_s13 = smov 0  }
   0x4   :  { %s1079_s14 = smov 0   ;;  %s1081_s15 = smov 0  }
   0x5   :  { %s1083_s16 = smov 0   ;;  %s1085_s17 = smov 0  }
   0x6 LB: > { %s794_s18 = sadd.s32 4294967295, %s1040_s17   ;;  %s795_s19 = sadd.s32 4294967294, %s1040_s17   ;;  %s1040_s17 = sphi %s1085_s17, %s19_s17   ;;  %s1036_s16 = sphi %s1083_s16, %s1315_s16   ;;  %s1032_s15 = sphi %s1081_s15, %s1314_s15   ;;  %s1028_s14 = sphi %s1079_s14, %s1313_s14   ;;  %s1024_s13 = sphi %s1077_s13, %s1312_s13   ;;  %s1020_s12 = sphi %s1075_s12, %s1311_s12  }
   0x7   : > { %s34_s20 = sadd.s32 1, %s1036_s16  ;;  %s45_s21 = sadd.s32 1, %s1028_s14 }
   0x8   : > { %p36_p0 = scmp.ge.s32.totalorder %s34_s20, 2  ;;  %p52_p1 = scmp.ne.s32.totalorder %s1028_s14, %s1024_s13 }
   0x9   : > { %p53_p2 = scmp.eq.s32.totalorder %s1040_s17, 0  ;;  %p58_p3 = scmp.ne.s32.totalorder %s1024_s13, %s1020_s12 }
   0xa   : > { %s1317_s20 = smov (%p36_p0, %s34_s20), 0  ;;  %p59_p5 = scmp.eq.s32.totalorder %s794_s18, 0 }
   0xb   : > { %p1116_p4 = por %p53_p2, %p52_p1  ;;  %s42_s23 = ssub.s32 %s1036_s16, %s1317_s20 }
   0xc   : > { %p138_p6 = scmp.eq.s32.totalorder %s794_s18, 1  ;;  %p43_p7 = scmp.eq.s32.totalorder %s42_s23, 0 }
   0xd   : > { %p1122_p8 = por %p59_p5, %p58_p3  ;;  %p144_p10 = scmp.eq.s32.totalorder %s795_s19, 1 }
   0xe   : > { %p1126_p9 = por %p138_p6, %p52_p1  ;;  %p852_p13 = scmp.lt.s32.totalorder %s1040_s17, 2 }
   0xf   : > { %s1131_s26 = scalar_select %p43_p7, %s1028_s14, %s45_s21  }
  0x10   : > { %s1304_s25 = scalar_select %p1126_p9, 1, 0 }
  0x11   : > { %p1133_p11 = por %p144_p10, %p58_p3  ;;  %s179_s28 = sand.u32 1, %s1028_s14  }
  0x12   : > { %s836_s29 = smul.u32 24, %s179_s28  ;;  %p1143_p0 = pnand %p852_p13, %p1116_p4 }
  0x13   : > { %s1305_s27 = scalar_select %p1133_p11, 1, 0 }
  0x14   : > { %s837_s30 = smul.u32 384, %s1036_s16  ;;  %s183_s8 = scalar_lea.vmem [#allocation3], %s836_s29 }
  0x15   : > { %s190_s9 = sshll.u32 %s183_s8, 4  ;;  %s1155_s10 = scalar_lea.sflag [#allocation4], %s179_s28  ;;  %s1152_s9 = int_to_ptr.vmem [resolvable:$true] %s190_s9 }
  0x16   : > { %s1150_s7 = scalar_lea.hbm %s1297_s0, %s837_s30  ;;  %p930_p3 = pneg %p1143_p0 }
  0x17   : > { %s928_s11 = scalar_lea.hbm %s1150_s7, 384  ;;  %s933_s21 = scalar_lea.hbm %s1297_s0, 768 }
  0x18   : > { %p929_p2 = scmp.ne.s32.totalorder %s1150_s7, %s928_s11  ;;  %p934_p6 = scmp.lt.u32.totalorder %s1150_s7, %s1297_s0 }
  0x19   : > { %p935_p7 = scmp.lt.u32.totalorder %s933_s21, %s928_s11  ;;  %p937_p13 = scmp.lt.u32.totalorder %s928_s11, %s1150_s7 }
  0x1a   : > { %p931_p4 = pnand %p930_p3, %p929_p2 }
  0x1b   : > { %p936_p10 = por %p935_p7, %p934_p6 }
  0x1c   : > { %p932_p5 = pneg %p931_p4 }
  0x1d   : > { %p938_p12 = por %p937_p13, %p936_p10 }
  0x1f   : > { %p939_p1 = pnand %p938_p12, %p932_p5 }
  0x21   : > { %942 = shalt.err (!%p939_p1)
}
  0x22   : > { %s943_s28 = scalar_lea.vmem %s1152_s9, 384  ;;  %s1042_s29 = smov [#allocation3]  }
  0x23   : > { %p944_p2 = scmp.ne.s32.totalorder %s1152_s9, %s943_s28  ;;  %s948_s30 = sshll.u32 %s1042_s29, 4  ;;  %s949_s30 = int_to_ptr.vmem [resolvable:$false] %s948_s30 }
  0x24   : > { %s950_s5 = scalar_lea.vmem %s949_s30, 768  ;;  %p951_p9 = scmp.lt.s32.totalorder %s1152_s9, %s949_s30 }
  0x25   : > { %p946_p4 = pnand %p944_p2, %p930_p3  ;;  %p952_p6 = scmp.lt.s32.totalorder %s950_s5, %s943_s28 }
  0x27   : > { %p947_p11 = pneg %p946_p4  ;;  %p953_p7 = por %p952_p6, %p951_p9 }
  0x29   : > { %p954_p10 = pnand %p953_p7, %p947_p11 }
  0x2b   : > { %957 = shalt.err (!%p954_p10)
}
  0x2c   : > { %s1043_s6 = smov 192   ;;  %s1044_s8 = smov 12  }
  0x2d   : > { %847 = dma.hbm_to_vmem [thread:$0]  (!%p1143_p0), %s1150_s7, 384, %s1152_s9, %s1155_s10, %s1043_s6, %s1043_s6, %s1044_s8  }
  0x2e   : > { %p198_p12 = scmp.lt.s32.totalorder %s1040_s17, 3  ;;  %p1307_p1 = scmp.ge.s32.totalorder %s1040_s17, 1 }
  0x30   : > { %p199_p3 = pnand %p1307_p1, %p198_p12 }
  0x31   : > { %s1187_s11 = sand.u32 (!%p199_p3), 1, %s1024_s13  }
  0x32   : > { %202 = sbr.rel (%p199_p3) target bundleno = 458 (0x1ca), region = 32  ;;  %s205_s19 = scalar_lea.sflag (!%p199_p3), [#allocation4], %s1187_s11 }
  0x33   : > { %s838_s18 = smul.u32 (!%p199_p3), 24, %s1187_s11 }
  0x35   : > { %s1193_s21 = scalar_lea.vmem (!%p199_p3), [#allocation3], %s838_s18 }
  0x39   : > { %1011 = dma.done.wait (%p1122_p8), %s205_s19, 384  }
  0x3a   : > { %1013 = vsyncadd (%p1122_p8), %s205_s19, 4294966912  ;;  %v1045_v0 = vmov 0   ;;  %v914_v1 = vld [vmem:[%s1193_s21 + $0x4] ss:$12 sps:$4 sm:$0xff]   ;;  %v916_v2 = vld [vmem:[%s1193_s21] ss:$12 sps:$4 sm:$0xff]  }
  0x3b   : > { %616 = vmatprep.subr.bf16.mxu1 %v1045_v0  ;;  %913 = vset.pattern.permute.xlu0 %v1045_v0  ;;  %s1046_s4 = smov 127   ;;  %v917_v3 = vld [vmem:[%s1193_s21 + $0x8] ss:$12 sps:$4 sm:$0xff]   ;;  %s1047_s24 = smov 126   ;;  %vm275_vm0 = vcmask 261120   ;;  %vm571_vm1 = vcmask 130048  }
  0x3c   : > { %296 = vrot.lane.b32.xlu0 %v914_v1, %s1046_s4  ;;  %575 = vmatprep.subr.bf16.mxu0 %v914_v1  ;;  %v918_v4 = vld [vmem:[%s1193_s21 + $0x8] ss:$12 sps:$4 sm:$0xff]   ;;  %s1048_s7 = smov 110   ;;  %s1049_s9 = smov 109   ;;  %vm300_vm2 = vcmask 1039360   ;;  %vm332_vm3 = vcmask 1031168  }
  0x3d   : > { %294 = vrot.lane.b32.xlu1 %v916_v2, %s1046_s4  ;;  %576 = vmatpush1.bf16.msra.mxu0 %v916_v2  ;;  %v925_v5 = vld [vmem:[%s1193_s21 + $0x8] ss:$12 sps:$4 sm:$0xff]   ;;  %s1050_s10 = smov 108   ;;  %s1051_s22 = smov 92   ;;  %vm364_vm4 = vcmask 900096   ;;  %vm396_vm5 = vcmask 891904  }
  0x3e   : > { %v919_v6 = vld [vmem:[%s1193_s21 + $0x8] ss:$12 sps:$4 sm:$0xff]   ;;  %276 = vst.msk [vmem:[#allocation2 + $0x10] sm:$0xff] %vm275_vm0, %v925_v5  ;;  %s1052_s29 = smov 91   ;;  %s1053_s30 = smov 90   ;;  %vm428_vm6 = vcmask 883712  }
  0x3f   : > { %v920_v7 = vld [vmem:[%s1193_s21 + $0x8] ss:$12 sps:$4 sm:$0xff]   ;;  %vm460_vm7 = vcmask 752640   ;;  %vm492_vm8 = vcmask 744448   ;;  %vm524_vm9 = vcmask 736256   ;;  %s239_s8 = scalar_lea.vmem [#allocation6], %s838_s18 }
  0x40   : > { %298 = vrot.lane.b32.xlu0 %v917_v3, %s1046_s4  ;;  %v921_v9 = vld [vmem:[%s1193_s21 + $0x8] ss:$12 sps:$4 sm:$0xff]   ;;  %s839_s19 = smul.u32 384, %s1032_s15  ;;  %s660_s15 = scalar_lea.sflag [#allocation5], %s1187_s11 }
  0x41   : > { %328 = vrot.lane.b32.xlu1 %v914_v1, %s1047_s24  ;;  %v922_v10 = vld [vmem:[%s1193_s21 + $0x8] ss:$12 sps:$4 sm:$0xff]   ;;  %p1308_p9 = scmp.ne.s32.totalorder %s1304_s25, 0 }
  0x42   : > { %v923_v11 = vld [vmem:[%s1193_s21 + $0x8] ss:$12 sps:$4 sm:$0xff]  }
  0x43   : > { %v1216_v12 = vld [vmem:[%s1298_s1] sm:$0xff] }
  0x44   : > { %330 = vrot.lane.b32.xlu0 %v918_v4, %s1047_s24  ;;  %v830_v13 = vcombine.high %v1216_v12, %v1216_v12  ;;  %v924_v14 = vld [vmem:[%s1193_s21 + $0x8] ss:$12 sps:$4 sm:$0xff]   ;;  %v829_v63 = vcombine.low %v1216_v12, %v1216_v12  ;;  %s678_s21 = sshll.u32 %s239_s8, 4  ;;  %s1249_s21 = int_to_ptr.vmem [resolvable:$true] %s678_s21 }
  0x45   : > { %326 = vrot.lane.b32.xlu1 %v916_v2, %s1047_s24  ;;  %v535_v8 = vld [vmem:[#allocation2 + $0x10] sm:$0xff]  ;;  %v252_v15 = vld [vmem:[%s1299_s2] sm:$0xff]  ;;  %s958_s18 = scalar_lea.vmem %s1249_s21, 384 }
  0x46   : > { %617 = vmatpush1.bf16.msra.mxu1 %v535_v8  ;;  %832 = vmatprep.mubr.msk.bf16.mxu1 %vm571_vm1, %v830_v13  ;;  %p959_p8 = scmp.ne.s32.totalorder %s1249_s21, %s958_s18 }
  0x47   : > { %618 = vmatprep.subr.bf16.mxu1 %v1045_v0  ;;  %831 = vmatprep.mubr.msk.bf16.mxu0 %vm571_vm1, %v830_v13 }
  0x48   : > { %360 = vrot.lane.b32.xlu0 %v914_v1, %s1048_s7  ;;  %p960_p11 = pnand %p959_p8, %p1308_p9 }
  0x49   : > { %362 = vrot.lane.b32.xlu1 %v919_v6, %s1048_s7 }
  0x4a   : > { %p961_p0 = pneg %p960_p11 }
  0x4c   : > { %358 = vrot.lane.b32.xlu0 %v916_v2, %s1048_s7  ;;  %s1247_s7 = scalar_lea.hbm %s1300_s3, %s839_s19 }
  0x4d   : > { %392 = vrot.lane.b32.xlu1 %v914_v1, %s1049_s9 }
  0x50   : > { %394 = vrot.lane.b32.xlu0 %v920_v7, %s1049_s9 }
  0x51   : > { %390 = vrot.lane.b32.xlu1 %v916_v2, %s1049_s9  ;;  %s1054_s9 = smov [#allocation6]  }
  0x54   : > { %424 = vrot.lane.b32.xlu0 %v914_v1, %s1050_s10 }
  0x55   : > { %426 = vrot.lane.b32.xlu1 %v921_v9, %s1050_s10 }
  0x58   : > { %422 = vrot.lane.b32.xlu0 %v916_v2, %s1050_s10  ;;  %s962_s10 = sshll.u32 %s1054_s9, 4  ;;  %s963_s10 = int_to_ptr.vmem [resolvable:$false] %s962_s10 }
  0x59   : > { %456 = vrot.lane.b32.xlu1 %v914_v1, %s1051_s22  ;;  %p965_p5 = scmp.lt.s32.totalorder %s1249_s21, %s963_s10 }
  0x5c   : > { %458 = vrot.lane.b32.xlu0 %v922_v10, %s1051_s22 }
  0x5d   : > { %454 = vrot.lane.b32.xlu1 %v916_v2, %s1051_s22  ;;  %s964_s22 = scalar_lea.vmem %s963_s10, 768 }
  0x5e   : > { %p966_p13 = scmp.lt.s32.totalorder %s964_s22, %s958_s18 }
  0x60   : > { %488 = vrot.lane.b32.xlu0 %v914_v1, %s1052_s29  ;;  %p967_p2 = por %p966_p13, %p965_p5 }
  0x61   : > { %490 = vrot.lane.b32.xlu1 %v923_v11, %s1052_s29 }
  0x62   : > { %p968_p4 = pnand %p967_p2, %p961_p0 }
  0x64   : > { %486 = vrot.lane.b32.xlu0 %v916_v2, %s1052_s29 }
  0x65   : > { %520 = vrot.lane.b32.xlu1 %v914_v1, %s1053_s30 }
  0x68   : > { %522 = vrot.lane.b32.xlu0 %v924_v14, %s1053_s30 }
  0x69   : > { %518 = vrot.lane.b32.xlu1 %v916_v2, %s1053_s30 }
  0x6c   : > { %562 = vperm.xlu0 %913, %v252_v15  }
  0xae   : > { %v297_v16 = vpop.permute.xlu0 %296 }
  0xaf   : > { %v295_v17 = vpop.permute.xlu1 %294 }
  0xb0   : > { %v301_v18 = vsel %vm300_vm2, %v295_v17, %v297_v16 }
  0xb2   : > { %v299_v19 = vpop.permute.xlu0 %298 }
  0xb3   : > { %v302_v20 = vsel %vm300_vm2, %v297_v16, %v299_v19  ;;  %308 = vst.msk [vmem:[#allocation2 + $0x28] sm:$0xff] %vm275_vm0, %v299_v19  ;;  %v329_v21 = vpop.permute.xlu1 %328 }
  0xb4   : > { %577 = vmatprep.subr.bf16.mxu0 %v302_v20 }
  0xb5   : > { %578 = vmatpush1.bf16.msra.mxu0 %v301_v18 }
  0xb6   : > { %v331_v22 = vpop.permute.xlu0 %330 }
  0xb7   : > { %v334_v23 = vsel %vm332_vm3, %v329_v21, %v331_v22  ;;  %340 = vst.msk [vmem:[#allocation2 + $0x40] sm:$0xff] %vm275_vm0, %v331_v22  ;;  %v327_v24 = vpop.permute.xlu1 %326 }
  0xb8   : > { %v333_v25 = vsel %vm332_vm3, %v327_v24, %v329_v21  ;;  %579 = vmatprep.subr.bf16.mxu0 %v334_v23 }
  0xb9   : > { %580 = vmatpush1.bf16.msra.mxu0 %v333_v25 }
  0xba   : > { %v361_v26 = vpop.permute.xlu0 %360  ;;  %v538_v27 = vld [vmem:[#allocation2 + $0x28] sm:$0xff] }
  0xbb   : > { %v363_v28 = vpop.permute.xlu1 %362  ;;  %619 = vmatpush1.bf16.msra.mxu1 %v538_v27 }
  0xbc   : > { %v366_v29 = vsel %vm364_vm4, %v361_v26, %v363_v28  ;;  %372 = vst.msk [vmem:[#allocation2 + $0x58] sm:$0xff] %vm275_vm0, %v363_v28  ;;  %620 = vmatprep.subr.bf16.mxu1 %v1045_v0 }
  0xbd   : > { %581 = vmatprep.subr.bf16.mxu0 %v366_v29 }
  0xbe   : > { %v359_v30 = vpop.permute.xlu0 %358  ;;  %v541_v31 = vld [vmem:[#allocation2 + $0x40] sm:$0xff] }
  0xbf   : > { %v365_v32 = vsel %vm364_vm4, %v359_v30, %v361_v26  ;;  %v393_v33 = vpop.permute.xlu1 %392  ;;  %621 = vmatpush1.bf16.msra.mxu1 %v541_v31 }
  0xc0   : > { %622 = vmatprep.subr.bf16.mxu1 %v1045_v0  ;;  %582 = vmatpush1.bf16.msra.mxu0 %v365_v32 }
  0xc2   : > { %v395_v34 = vpop.permute.xlu0 %394 }
  0xc3   : > { %v398_v35 = vsel %vm396_vm5, %v393_v33, %v395_v34  ;;  %404 = vst.msk [vmem:[#allocation2 + $0x70] sm:$0xff] %vm275_vm0, %v395_v34  ;;  %v391_v36 = vpop.permute.xlu1 %390  ;;  %v544_v37 = vld [vmem:[#allocation2 + $0x58] sm:$0xff] }
  0xc4   : > { %v397_v38 = vsel %vm396_vm5, %v391_v36, %v393_v33  ;;  %623 = vmatpush1.bf16.msra.mxu1 %v544_v37  ;;  %583 = vmatprep.subr.bf16.mxu0 %v398_v35 }
  0xc5   : > { %624 = vmatprep.subr.bf16.mxu1 %v1045_v0  ;;  %584 = vmatpush1.bf16.msra.mxu0 %v397_v38 }
  0xc6   : > { %v425_v39 = vpop.permute.xlu0 %424 }
  0xc7   : > { %v427_v40 = vpop.permute.xlu1 %426 }
  0xc8   : > { %v430_v41 = vsel %vm428_vm6, %v425_v39, %v427_v40  ;;  %436 = vst.msk [vmem:[#allocation2 + $0x88] sm:$0xff] %vm275_vm0, %v427_v40 }
  0xc9   : > { %585 = vmatprep.subr.bf16.mxu0 %v430_v41 }
  0xca   : > { %v423_v42 = vpop.permute.xlu0 %422  ;;  %v547_v43 = vld [vmem:[#allocation2 + $0x70] sm:$0xff] }
  0xcb   : > { %v429_v44 = vsel %vm428_vm6, %v423_v42, %v425_v39  ;;  %v457_v45 = vpop.permute.xlu1 %456  ;;  %625 = vmatpush1.bf16.msra.mxu1 %v547_v43 }
  0xcc   : > { %626 = vmatprep.subr.bf16.mxu1 %v1045_v0  ;;  %586 = vmatpush1.bf16.msra.mxu0 %v429_v44 }
  0xce   : > { %v459_v46 = vpop.permute.xlu0 %458 }
  0xcf   : > { %v462_v47 = vsel %vm460_vm7, %v457_v45, %v459_v46  ;;  %468 = vst.msk [vmem:[#allocation2 + $0xa0] sm:$0xff] %vm275_vm0, %v459_v46  ;;  %v455_v48 = vpop.permute.xlu1 %454  ;;  %v550_v49 = vld [vmem:[#allocation2 + $0x88] sm:$0xff] }
  0xd0   : > { %v461_v50 = vsel %vm460_vm7, %v455_v48, %v457_v45  ;;  %627 = vmatpush1.bf16.msra.mxu1 %v550_v49  ;;  %587 = vmatprep.subr.bf16.mxu0 %v462_v47 }
  0xd1   : > { %628 = vmatprep.subr.bf16.mxu1 %v1045_v0  ;;  %588 = vmatpush1.bf16.msra.mxu0 %v461_v50 }
  0xd2   : > { %v489_v51 = vpop.permute.xlu0 %488 }
  0xd3   : > { %v491_v52 = vpop.permute.xlu1 %490 }
  0xd4   : > { %v494_v53 = vsel %vm492_vm8, %v489_v51, %v491_v52  ;;  %500 = vst.msk [vmem:[#allocation2 + $0xb8] sm:$0xff] %vm275_vm0, %v491_v52 }
  0xd5   : > { %589 = vmatprep.subr.bf16.mxu0 %v494_v53 }
  0xd6   : > { %v487_v54 = vpop.permute.xlu0 %486  ;;  %v553_v55 = vld [vmem:[#allocation2 + $0xa0] sm:$0xff] }
  0xd7   : > { %v493_v56 = vsel %vm492_vm8, %v487_v54, %v489_v51  ;;  %v521_v57 = vpop.permute.xlu1 %520  ;;  %629 = vmatpush1.bf16.msra.mxu1 %v553_v55 }
  0xd8   : > { %630 = vmatprep.subr.bf16.mxu1 %v1045_v0  ;;  %590 = vmatpush1.bf16.msra.mxu0 %v493_v56 }
  0xda   : > { %v523_v58 = vpop.permute.xlu0 %522 }
  0xdb   : > { %v526_v59 = vsel %vm524_vm9, %v521_v57, %v523_v58  ;;  %532 = vst.msk [vmem:[#allocation2 + $0xd0] sm:$0xff] %vm275_vm0, %v523_v58  ;;  %v519_v60 = vpop.permute.xlu1 %518  ;;  %v556_v61 = vld [vmem:[#allocation2 + $0xb8] sm:$0xff] }
  0xdc   : > { %v525_v62 = vsel %vm524_vm9, %v519_v60, %v521_v57  ;;  %631 = vmatpush1.bf16.msra.mxu1 %v556_v61  ;;  %591 = vmatprep.subr.bf16.mxu0 %v526_v59 }
  0xdd   : > { %632 = vmatprep.subr.bf16.mxu1 %v1045_v0  ;;  %592 = vmatpush1.bf16.msra.mxu0 %v525_v62 }
  0xe0   : > { %608 = vmatmul.mubr.bf16.vlgmr.msra.gmra.mrb[0].mxu0 %v829_v63 }
  0xe2   : > { %v559_v1 = vld [vmem:[#allocation2 + $0xd0] sm:$0xff] }
  0xe3   : > { %633 = vmatpush1.bf16.msra.mxu1 %v559_v1 }
  0xe6   : > { %649 = vmatmul.mubr.bf16.vlgmr.msra.gmra.mrb[0].mxu1 %v829_v63 }
  0xeb   : > { %v563_v2 = vpop.permute.xlu0 %562 }
 0x1b3   : > { %v609_v3 = vpop.f32.mrb[0].mxu0 }
 0x1b4   : > { %v610_v4 = vadd.f32 %v609_v3, %v563_v2  ;;  %v611_v5 = vpop.f32.mrb[1].mxu0 }
 0x1b5   : > { %v612_v6 = vadd.f32 %v611_v5, %v563_v2  ;;  %v613_v7 = vpop.f32.mrb[2].mxu0 }
 0x1b6   : > { %656 = vst [vmem:[%s239_s8] sm:$0xff] %v610_v4  ;;  %v614_v8 = vpop.f32.mrb[3].mxu0 }
 0x1b7   : > { %657 = vst [vmem:[%s239_s8 + $0x8] sm:$0xff] %v612_v6 }
 0x1b9   : > { %v650_v0 = vpop.f32.mrb[0].mxu1 }
 0x1ba   : > { %v652_v9 = vpop.f32.mrb[1].mxu1  ;;  %v651_v10 = vadd.f32 %v650_v0, %v563_v2 }
 0x1bb   : > { %v653_v11 = vpop.f32.mrb[2].mxu1 }
 0x1bc   : > { %658 = vst.msk [vmem:[%s239_s8 + $0x10] sm:$0xff] %vm275_vm0, %v651_v10  ;;  %v654_v12 = vpop.f32.mrb[3].mxu1 }
 0x1bd   : > { %971 = shalt.err (!%p968_p4)
}
 0x1be   : > { %s972_s11 = scalar_lea.hbm %s1247_s7, 384  ;;  %s976_s29 = scalar_lea.hbm %s1300_s3, 768 }
 0x1bf   : > { %p973_p6 = scmp.ne.s32.totalorder %s1247_s7, %s972_s11  ;;  %p977_p12 = scmp.lt.u32.totalorder %s1247_s7, %s1300_s3 }
 0x1c0   : > { %p978_p1 = scmp.lt.u32.totalorder %s976_s29, %s972_s11  ;;  %p980_p8 = scmp.lt.u32.totalorder %s972_s11, %s1247_s7 }
 0x1c1   : > { %p974_p7 = pnand %p973_p6, %p1308_p9 }
 0x1c2   : > { %p979_p3 = por %p978_p1, %p977_p12 }
 0x1c3   : > { %p975_p10 = pneg %p974_p7 }
 0x1c4   : > { %p981_p11 = por %p980_p8, %p979_p3 }
 0x1c6   : > { %p982_p0 = pnand %p981_p11, %p975_p10 }
 0x1c8   : > { %985 = shalt.err (!%p982_p0)
}
 0x1c9   : > { %842 = dma.vmem_to_hbm [thread:$0]  (%p1308_p9), %s1249_s21, 384, %s1247_s7, %s660_s15  }
 0x1ca PF: > { %s690_s6 = sand.u32 1, %s1020_s12   ;;  %p1309_p5 = scmp.ne.s32.totalorder %s1305_s27, 0 }
 0x1cb   : > { %p1310_p13 = scmp.ge.s32.totalorder %s1040_s17, 2  ;;  %s691_s8 = scalar_lea.sflag [#allocation5], %s690_s6 }
 0x1cd   : > { %p849_p2 = pnand %p1310_p13, %p1309_p5 }
 0x1cf   : > { %1015 = dma.done.wait (!%p849_p2), %s691_s8, 384  }
 0x1d0   : > { %1017 = vsyncadd (!%p849_p2), %s691_s8, 4294966912  ;;  %s19_s17 = sadd.s32 1, %s1040_s17   ;;  %s1311_s12 = smov %s1024_s13 }
 0x1d1   : > { %p16_p4 = scmp.ge.s32.totalorder %s19_s17, 4   ;;  %s1312_s13 = smov %s1028_s14 }
 0x1d2   : > { %s1313_s14 = smov %s1131_s26  ;;  %s1314_s15 = smov %s1036_s16 }
 0x1d3   : > { %s1315_s16 = smov %s1317_s20  ;;  %18 = sbr.rel (!%p16_p4) target bundleno = 6 (0x6), region = 83 }
 0x1da   :  { %696 = vsyncpa [#allocation4], 1 }
 0x1db   :  { %698 = vsyncpa [#allocation4 + $0x1], 1 }
 0x1dc   :  { %699 = vsyncpa [#allocation5], 1 }
 0x1dd   :  { %701 = vsyncpa [#allocation5 + $0x1], 1 }

</bundles_post_ra>
